<compile_context>
chip_gen: v7x
topology: tpu7x:2x2x1
jax: 0.10.0
libtpu: 0.0.40
codegen_flags: <defaults>
</compile_context>

<pallas_src>
import functools

import jax
import jax.numpy as jnp
from jax import lax
from jax.experimental import pallas as pl
from jax.experimental.pallas import tpu as pltpu


# ---------------------------------------------------------------------------
# Small helpers
# ---------------------------------------------------------------------------
def _sublane_group(itemsize):
    """Packed sublane tile height for the dtype (8 f32 / 16 bf16 / 32 int8)."""
    if itemsize >= 4:
        return 8
    if itemsize == 2:
        return 16
    return 32


@functools.lru_cache(maxsize=1)
def _num_tensorcores():
    """2 for megacore parts (v4 / v5p / v7x), else 1. Best-effort query."""
    try:
        kind = (getattr(jax.devices()[0], "device_kind", "") or "").lower()
        if ("v7" in kind) or ("v4" in kind) or ("v5p" in kind):
            return 2
    except Exception:
        pass
    return 1


def _recip(x):
    """1/x on the EUP (approx rcp) + one Newton step => ~f32 accuracy, off the VALU."""
    r = pl.reciprocal(x, approx=True)
    return r * (2.0 - x * r)


# ---------------------------------------------------------------------------
# Row-blocked kernels (block = (ROWS_BLK, H*W); per-row stats are (ROWS_BLK, 1))
# ---------------------------------------------------------------------------
def _norm_full_kernel(x_ref, o_ref, *, eps, inv_n, inv_nm1):
    """mean and std both computed in-kernel (default path); single-pass sum/sumsq."""
    x = x_ref[...].astype(jnp.float32)
    s = jnp.sum(x, axis=-1, keepdims=True)
    q = jnp.sum(x * x, axis=-1, keepdims=True)
    mean = s * inv_n
    var = jnp.maximum((q - s * mean) * inv_nm1, 0.0)        # unbiased (ddof=1)
    inv = _recip(jnp.sqrt(var) + eps)
    o_ref[...] = ((x - mean) * inv).astype(o_ref.dtype)


def _norm_given_std_kernel(x_ref, std_ref, o_ref, *, eps, inv_n, rows_blk, n_blocks):
    """mean computed in-kernel, std supplied (resident (rows,1) f32 VMEM array)."""
    x = x_ref[...].astype(jnp.float32)
    mean = jnp.sum(x, axis=-1, keepdims=True) * inv_n
    if n_blocks == 1:
        std = std_ref[...]
    else:
        r0 = pl.multiple_of(pl.program_id(0) * rows_blk, rows_blk)
        std = std_ref[pl.ds(r0, rows_blk), :]
    o_ref[...] = ((x - mean) * _recip(std + eps)).astype(o_ref.dtype)


def _norm_given_mean_kernel(x_ref, mean_ref, o_ref, *, eps, inv_n, inv_nm1,
                            rows_blk, n_blocks):
    """std recomputed in-kernel (torch `else` branch), mean supplied (resident)."""
    x = x_ref[...].astype(jnp.float32)
    s = jnp.sum(x, axis=-1, keepdims=True)
    q = jnp.sum(x * x, axis=-1, keepdims=True)
    m = s * inv_n                                           # torch.std uses its own mean
    var = jnp.maximum((q - s * m) * inv_nm1, 0.0)
    inv = _recip(jnp.sqrt(var) + eps)
    if n_blocks == 1:
        mean_given = mean_ref[...]
    else:
        r0 = pl.multiple_of(pl.program_id(0) * rows_blk, rows_blk)
        mean_given = mean_ref[pl.ds(r0, rows_blk), :]
    o_ref[...] = ((x - mean_given) * inv).astype(o_ref.dtype)


# ---------------------------------------------------------------------------
# Lane-chunked kernels (large-H*W fallback): block = (ROWS_BLK, LANE_CHUNK)
# ---------------------------------------------------------------------------
def _stats_lane_kernel(x_ref, mean_ref, std_ref, sum_sc, sq_sc, *,
                       inv_n, inv_nm1, lane_chunk, n_total):
    j = pl.program_id(1)

    @pl.when(j == 0)
    def _():
        sum_sc[...] = jnp.zeros_like(sum_sc)
        sq_sc[...] = jnp.zeros_like(sq_sc)

    x = x_ref[...].astype(jnp.float32)
    if n_total % lane_chunk != 0:                 # static: mask ragged lane tail
        col = lax.broadcasted_iota(jnp.int32, x.shape, 1) + j * lane_chunk
        x = jnp.where(col < n_total, x, 0.0)
    sum_sc[...] += jnp.sum(x, axis=-1, keepdims=True)
    sq_sc[...] += jnp.sum(x * x, axis=-1, keepdims=True)

    @pl.when(j == pl.num_programs(1) - 1)
    def _():
        s = sum_sc[...]
        mean = s * inv_n
        var = jnp.maximum((sq_sc[...] - s * mean) * inv_nm1, 0.0)
        mean_ref[...] = mean
        std_ref[...] = jnp.sqrt(var)


def _norm_both_lane_kernel(x_ref, mean_ref, std_ref, o_ref, *, eps):
    x = x_ref[...].astype(jnp.float32)
    inv = _recip(std_ref[...] + eps)
    o_ref[...] = ((x - mean_ref[...]) * inv).astype(o_ref.dtype)


def _lane_chunked_forward(x2, mean, std, *, eps, inv_n, inv_nm1,
                          rows, n, dtype, itemsize, sub, max_block_bytes):
    """Two-pass path for rows too large to fit whole in a VMEM block."""
    rows_blk = sub if rows > sub else rows
    lane_chunk = max(128, (max_block_bytes // max(1, rows_blk * itemsize)) // 128 * 128)
    lane_chunk = min(lane_chunk, ((n + 127) // 128) * 128)
    n_row_blocks = pl.cdiv(rows, rows_blk)
    n_lane_blocks = pl.cdiv(n, lane_chunk)

    x_spec = pl.BlockSpec((rows_blk, lane_chunk), lambda i, j: (i, j))
    stat_spec = pl.BlockSpec((rows_blk, 1), lambda i, j: (i, 0))

    rows_pad = ((rows_blk + sub - 1) // sub) * sub
    block_bytes = rows_pad * lane_chunk * itemsize
    est = 4 * block_bytes + 3 * rows_pad * lane_chunk * 4 + (2 << 20)
    vmem_limit = int(min(48 << 20, max(16 << 20, est)))

    # Pass 1: per-row sum / sum-of-squares accumulated over lane chunks.
    stats_shape = jax.ShapeDtypeStruct((rows, 1), jnp.float32)
    mean_c, std_c = pl.pallas_call(
        functools.partial(_stats_lane_kernel, inv_n=inv_n, inv_nm1=inv_nm1,
                          lane_chunk=lane_chunk, n_total=n),
        out_shape=(stats_shape, stats_shape),
        grid=(n_row_blocks, n_lane_blocks),
        in_specs=[x_spec],
        out_specs=(stat_spec, stat_spec),
        scratch_shapes=[pltpu.VMEM((rows_blk, 1), jnp.float32),
                        pltpu.VMEM((rows_blk, 1), jnp.float32)],
        compiler_params=pltpu.CompilerParams(
            dimension_semantics=("parallel", "arbitrary"),
            vmem_limit_bytes=vmem_limit),
    )(x2)

    if mean is None and std is None:
        mean_use, std_use = mean_c, std_c
    elif mean is None:
        mean_use = mean_c
        std_use = jnp.asarray(std, jnp.float32).reshape(rows, 1)
    else:                                   # mean given -> std recomputed (torch `else`)
        mean_use = jnp.asarray(mean, jnp.float32).reshape(rows, 1)
        std_use = std_c

    # Pass 2: normalize.
    out2 = pl.pallas_call(
        functools.partial(_norm_both_lane_kernel, eps=eps),
        out_shape=jax.ShapeDtypeStruct((rows, n), dtype),
        grid=(n_row_blocks, n_lane_blocks),
        in_specs=[x_spec, stat_spec, stat_spec],
        out_specs=x_spec,
        compiler_params=pltpu.CompilerParams(
            dimension_semantics=("parallel", "parallel"),
            vmem_limit_bytes=vmem_limit),
    )(x2, mean_use, std_use)
    return out2


# ---------------------------------------------------------------------------
# Wrapper
# ---------------------------------------------------------------------------
def styled_instance_norm(x, mean=None, std=None, eps=0.0, *, max_block_bytes=None):
    """Pallas implementation of StyledInstanceNorm.forward for 4-D NCHW input."""
    # TODO(synk): 5-D (b, c, x, y, z) input (torch reduces over dims (2, 3) only,
    #             leaving z un-reduced) is not implemented; only the 4-D path is.
    assert x.ndim == 4, "only (b, c, h, w) supported"
    B, C, H, W = x.shape
    n = H * W
    rows = B * C

    eps = float(eps)
    inv_n = 1.0 / float(n)
    inv_nm1 = (1.0 / float(n - 1)) if n > 1 else float("nan")   # torch NaN for n==1

    dtype = x.dtype
    itemsize = jnp.dtype(dtype).itemsize
    sub = _sublane_group(itemsize)
    row_bytes = n * itemsize

    if max_block_bytes is None:
        # Budget: 2x double-buffered (in + out) blocks + ~3 f32 block temporaries,
        # targeting <= ~40 MiB total so it fits v7x's 64 MiB physical VMEM.
        max_block_bytes = (40 << 20) // (4 + (3 * 4) // itemsize)

    x2 = x.reshape(rows, n)       # zero-copy lane-dense view: one instance per row

    # Large-H*W fallback: even `sub` full rows exceed the block budget.
    if sub * row_bytes > max_block_bytes:
        out2 = _lane_chunked_forward(
            x2, mean, std, eps=eps, inv_n=inv_n, inv_nm1=inv_nm1,
            rows=rows, n=n, dtype=dtype, itemsize=itemsize, sub=sub,
            max_block_bytes=max_block_bytes)
        return out2.reshape(B, C, H, W)

    # Row-blocked main path.
    max_rows = max(sub, (max_block_bytes // row_bytes) // sub * sub)
    if rows <= max_rows:
        rows_blk, n_blocks = rows, 1
        # 2-way split only on dual-TensorCore parts so the "parallel" axis
        # load-balances across the megacore; skipped on v5e/v6e (pure overhead).
        if (_num_tensorcores() >= 2 and rows % (2 * sub) == 0
                and (rows // 2) * row_bytes >= (256 << 10)):
            rows_blk, n_blocks = rows // 2, 2
    else:
        rows_blk = max_rows
        n_blocks = pl.cdiv(rows, rows_blk)    # ragged last block: no host pad/slice

    n_pad = ((n + 127) // 128) * 128
    rows_pad = ((rows_blk + sub - 1) // sub) * sub
    est = 4 * rows_pad * n_pad * itemsize + 3 * rows_pad * n_pad * 4 + (2 << 20)
    vmem_limit = int(min(48 << 20, max(16 << 20, est)))

    x_spec = pl.BlockSpec((rows_blk, n), lambda i: (i, 0))
    out_shape = jax.ShapeDtypeStruct((rows, n), dtype)
    cparams = pltpu.CompilerParams(dimension_semantics=("parallel",),
                                   vmem_limit_bytes=vmem_limit)

    # Given per-instance stats stay fully resident in VMEM (constant index_map,
    # one DMA total) and are sliced per row-block in the kernel.  Only this tiny
    # array is ever padded (a few KiB), never the activation tensor.
    stat_rows = n_blocks * rows_blk
    stat_spec = pl.BlockSpec((stat_rows, 1), lambda i: (0, 0))

    def _prep_stat(s):
        s2 = jnp.asarray(s, jnp.float32).reshape(rows, 1)
        if stat_rows != rows:
            s2 = jnp.pad(s2, ((0, stat_rows - rows), (0, 0)), constant_values=1.0)
        return s2

    if mean is None and std is None:
        out2 = pl.pallas_call(
            functools.partial(_norm_full_kernel, eps=eps, inv_n=inv_n,
                              inv_nm1=inv_nm1),
            out_shape=out_shape, grid=(n_blocks,),
            in_specs=[x_spec], out_specs=x_spec,
            compiler_params=cparams,
        )(x2)
    elif mean is None:        # std given, mean computed in kernel
        out2 = pl.pallas_call(
            functools.partial(_norm_given_std_kernel, eps=eps, inv_n=inv_n,
                              rows_blk=rows_blk, n_blocks=n_blocks),
            out_shape=out_shape, grid=(n_blocks,),
            in_specs=[x_spec, stat_spec], out_specs=x_spec,
            compiler_params=cparams,
        )(x2, _prep_stat(std))
    else:                     # mean given -> std recomputed in kernel (torch `else`)
        out2 = pl.pallas_call(
            functools.partial(_norm_given_mean_kernel, eps=eps, inv_n=inv_n,
                              inv_nm1=inv_nm1, rows_blk=rows_blk, n_blocks=n_blocks),
            out_shape=out_shape, grid=(n_blocks,),
            in_specs=[x_spec, stat_spec], out_specs=x_spec,
            compiler_params=cparams,
        )(x2, _prep_stat(mean))

    return out2.reshape(B, C, H, W)


# ---------------------------------------------------------------------------
# Reference (plain JAX) for validation
# ---------------------------------------------------------------------------
def _ref_forward(x, mean=None, std=None, eps=0.0):
    def _mean(x):
        return jnp.mean(x, axis=(2, 3), keepdims=True)

    def _std(x):
        return jnp.std(x, axis=(2, 3), keepdims=True, ddof=1)

    if mean is None and std is None:
        mean, std = _mean(x), _std(x)
    elif mean is None:
        mean = _mean(x)
    else:
        std = _std(x)
    return (x - mean) / (std + eps)


if __name__ == "__main__":
    key = jax.random.PRNGKey(0)
    B, C, H, W = 2, 4, 16, 16
    x = jax.random.normal(key, (B, C, H, W), dtype=jnp.float32)

    # Default path: mean and std computed inside the kernel.
    out = jax.block_until_ready(styled_instance_norm(x))
    assert jnp.allclose(out, _ref_forward(x), atol=1e-4, rtol=1e-4)

    # mean-given branch (std recomputed in kernel, torch `else` semantics).
    given_mean = jnp.mean(x, axis=(2, 3), keepdims=True) + 0.1
    out_m = jax.block_until_ready(styled_instance_norm(x, mean=given_mean))
    assert jnp.allclose(out_m, _ref_forward(x, mean=given_mean), atol=1e-4, rtol=1e-4)

    # std-given branch (mean computed in kernel).
    given_std = jnp.std(x, axis=(2, 3), keepdims=True, ddof=1) + 0.5
    out_s = jax.block_until_ready(styled_instance_norm(x, std=given_std))
    assert jnp.allclose(out_s, _ref_forward(x, std=given_std), atol=1e-4, rtol=1e-4)

    # Multi-row-block path with a ragged last block (no host pad/slice), forced
    # by a small block budget.
    x3 = jax.random.normal(jax.random.PRNGKey(1), (3, 20, 32, 32), dtype=jnp.float32)
    out3 = jax.block_until_ready(
        styled_instance_norm(x3, eps=1e-5, max_block_bytes=64 * 1024))
    assert jnp.allclose(out3, _ref_forward(x3, eps=1e-5), atol=1e-4, rtol=1e-4)

    # mean-given branch through the multi-block resident-stat path.
    gm3 = jnp.mean(x3, axis=(2, 3), keepdims=True) + 0.05
    out3m = jax.block_until_ready(
        styled_instance_norm(x3, mean=gm3, eps=1e-5, max_block_bytes=64 * 1024))
    assert jnp.allclose(out3m, _ref_forward(x3, mean=gm3, eps=1e-5),
                        atol=1e-4, rtol=1e-4)

    # Large-H*W (lane-chunked two-pass) fallback, forced with a tiny block budget;
    # exercises ragged rows (9) and a ragged last lane chunk (576 % 512 != 0).
    x4 = jax.random.normal(jax.random.PRNGKey(2), (3, 3, 24, 24), dtype=jnp.float32)
    out4 = jax.block_until_ready(
        styled_instance_norm(x4, eps=1e-5, max_block_bytes=16 * 1024))
    assert jnp.allclose(out4, _ref_forward(x4, eps=1e-5), atol=1e-4, rtol=1e-4)

    # Default (large-budget) path on a bigger shape.
    x5 = jax.random.normal(jax.random.PRNGKey(3), (4, 32, 32, 32), dtype=jnp.float32)
    out5 = jax.block_until_ready(styled_instance_norm(x5, eps=1e-5))
    assert jnp.allclose(out5, _ref_forward(x5, eps=1e-5), atol=1e-4, rtol=1e-4)

    print("KERNEL_OK")
</pallas_src>

<mosaic_0001>
module attributes {stable_mosaic.version = 11 : i64} {
  func.func @_norm_full_kernel(%arg0: i32, %arg1: memref<8x256xf32, #tpu.memory_space<vmem>>, %arg2: memref<8x256xf32, #tpu.memory_space<vmem>>) attributes {dimension_semantics = [#tpu.dimension_semantics<parallel>], iteration_bounds = array<i64: 1>, scalar_prefetch = 0 : i64, scratch_operands = 0 : i64, tpu.core_type = #tpu.core_type<tc>, window_params = [{transform_indices = @transform_0, window_bounds = array<i64: 8, 256>}, {transform_indices = @transform_1, window_bounds = array<i64: 8, 256>}]} {
    %c0 = arith.constant 0 : index
    %c0_0 = arith.constant 0 : index
    %0 = vector.load %arg1[%c0, %c0_0] : memref<8x256xf32, #tpu.memory_space<vmem>>, vector<8x256xf32>
    %cst = arith.constant dense<0.000000e+00> : vector<8xf32>
    %1 = vector.multi_reduction <add>, %0, %cst [1] : vector<8x256xf32> to vector<8xf32>
    %2 = vector.shape_cast %1 : vector<8xf32> to vector<8x1xf32>
    %3 = arith.mulf %0, %0 : vector<8x256xf32>
    %cst_1 = arith.constant dense<0.000000e+00> : vector<8xf32>
    %4 = vector.multi_reduction <add>, %3, %cst_1 [1] : vector<8x256xf32> to vector<8xf32>
    %5 = vector.shape_cast %4 : vector<8xf32> to vector<8x1xf32>
    %cst_2 = arith.constant 3.906250e-03 : f32
    %6 = vector.broadcast %cst_2 : f32 to vector<8x1xf32>
    %7 = arith.mulf %2, %6 : vector<8x1xf32>
    %8 = arith.mulf %2, %7 : vector<8x1xf32>
    %9 = arith.subf %5, %8 : vector<8x1xf32>
    %cst_3 = arith.constant 0.00392156886 : f32
    %10 = vector.broadcast %cst_3 : f32 to vector<8x1xf32>
    %11 = arith.mulf %9, %10 : vector<8x1xf32>
    %cst_4 = arith.constant 0.000000e+00 : f32
    %12 = vector.broadcast %cst_4 : f32 to vector<8x1xf32>
    %13 = arith.maximumf %11, %12 : vector<8x1xf32>
    %14 = math.sqrt %13 : vector<8x1xf32>
    %cst_5 = arith.constant 0.000000e+00 : f32
    %15 = vector.broadcast %cst_5 : f32 to vector<8x1xf32>
    %16 = arith.addf %14, %15 : vector<8x1xf32>
    %17 = tpu.reciprocal %16 {approx = true} : vector<8x1xf32> -> vector<8x1xf32>
    %18 = arith.mulf %16, %17 : vector<8x1xf32>
    %cst_6 = arith.constant 2.000000e+00 : f32
    %19 = vector.broadcast %cst_6 : f32 to vector<8x1xf32>
    %20 = arith.subf %19, %18 : vector<8x1xf32>
    %21 = arith.mulf %17, %20 : vector<8x1xf32>
    %22 = vector.broadcast %7 : vector<8x1xf32> to vector<8x256xf32>
    %23 = arith.subf %0, %22 : vector<8x256xf32>
    %24 = vector.broadcast %21 : vector<8x1xf32> to vector<8x256xf32>
    %25 = arith.mulf %23, %24 : vector<8x256xf32>
    %c0_7 = arith.constant 0 : index
    %c0_8 = arith.constant 0 : index
    %26 = vector.load %arg2[%c0_7, %c0_8] : memref<8x256xf32, #tpu.memory_space<vmem>>, vector<8x256xf32>
    tpu.vector_store %arg2[%c0_7, %c0_8], %25 {strides = array<i32>} : memref<8x256xf32, #tpu.memory_space<vmem>>, vector<8x256xf32>,
    return
  }
  func.func @transform_0(%arg0: i32) -> (i32, i32) {
    %c0_i32 = arith.constant 0 : i32
    %c0_i32_0 = arith.constant 0 : i32
    return %arg0, %c0_i32 : i32, i32
  }
  func.func @transform_1(%arg0: i32) -> (i32, i32) {
    %c0_i32 = arith.constant 0 : i32
    %c0_i32_0 = arith.constant 0 : i32
    return %arg0, %c0_i32 : i32, i32
  }
}

</mosaic_0001>

<bundles_post_ra>
// kernel: tpu_custom_call.1
= control target key start
LH: loop header
LB: loop body
LE: loop exit
PB: predicated region body
PF: predicated region fallthrough
CT: control target
= control target key end

     0   :  { %6 = vsyncpa [#allocation3], 0  ;;  %s159_s0 = inlined_call_operand.hbm [shape: f32[8,256], index: 0, kind: input, shape index: {}]   ;;  %s160_s1 = inlined_call_operand.hbm [shape: f32[8,256], index: 1, kind: output, shape index: {}]  }
   0x1   :  { %7 = vsyncpa [#allocation4], 0  ;;  %s123_s6 = smov [#allocation2]   ;;  %s75_s10 = scalar_lea.hbm %s159_s0, 256 }
   0x2   :  { %s14_s7 = sshll.u32 %s123_s6, 4  ;;  %p76_p0 = scmp.ne.s32.totalorder %s159_s0, %s75_s10  ;;  %s15_s7 = int_to_ptr.vmem [resolvable:$true] %s14_s7 }
   0x3   :  { %p79_p1 = scmp.lt.u32.totalorder %s75_s10, %s159_s0 }
   0x5   :  { %p81_p2 = pnand %p79_p1, %p76_p0 }
   0x7   :  { %84 = shalt.err (!%p81_p2)
}
   0x8   :  { %s85_s15 = scalar_lea.vmem %s15_s7, 256  ;;  %p90_p4 = scmp.lt.s32.totalorder %s15_s7, %s15_s7 }
   0x9   :  { %p86_p3 = scmp.ne.s32.totalorder %s15_s7, %s85_s15  ;;  %p91_p5 = scmp.lt.s32.totalorder %s85_s15, %s85_s15 }
   0xb   :  { %p92_p6 = por %p91_p5, %p90_p4 }
   0xd   :  { %p93_p7 = pnand %p92_p6, %p86_p3 }
   0xf   :  { %96 = shalt.err (!%p93_p7)
}
  0x10   :  { %17 = dma.hbm_to_vmem [thread:$0]  %s159_s0, 256, %s15_s7, [#allocation3]  }
  0x11   :  { %119 = dma.done.wait [#allocation3], 256  }
  0x12   :  { %120 = vsyncadd [#allocation3], 4294967040  ;;  %v21_v0 = vld [vmem:[#allocation2] sm:$0xff]  ;;  %v22_v1 = vld [vmem:[#allocation2 + $0x8] sm:$0xff]  ;;  %s124_s0 = smov [#allocation5]  }
  0x13   :  { %v23_v2 = vadd.f32 %v22_v1, %v21_v0  ;;  %v26_v3 = vmul.f32 %v21_v0, %v21_v0  ;;  %v27_v4 = vmul.f32 %v22_v1, %v22_v1  ;;  %s60_s18 = sshll.u32 %s124_s0, 4  ;;  %s61_s18 = int_to_ptr.vmem [resolvable:$true] %s60_s18 }
  0x14   :  { %s97_s19 = scalar_lea.vmem %s61_s18, 256  ;;  %p102_p9 = scmp.lt.s32.totalorder %s61_s18, %s61_s18 }
  0x15   :  { %24 = vadd.xlane.f32.xlu0 %v23_v2  ;;  %v28_v5 = vadd.f32 %v27_v4, %v26_v3  ;;  %p98_p8 = scmp.ne.s32.totalorder %s61_s18, %s97_s19  ;;  %p103_p10 = scmp.lt.s32.totalorder %s97_s19, %s97_s19 }
  0x17   :  { %p104_p11 = por %p103_p10, %p102_p9 }
  0x19   :  { %29 = vadd.xlane.f32.xlu0 %v28_v5  ;;  %p105_p12 = pnand %p104_p11, %p98_p8 }
  0xa2   :  { %v25_v6 = vpop.xlane.xlu0 %24 }
  0xa3   :  { %v31_v7 = vmul.f32 0.00390625, %v25_v6 }
  0xa5   :  { %v32_v8 = vmul.f32 %v31_v7, %v25_v6  ;;  %v48_v21 = vsub.f32 %v21_v0, %v31_v7  ;;  %v49_v22 = vsub.f32 %v22_v1, %v31_v7 }
  0xa6   :  { %v30_v9 = vpop.xlane.xlu0 %29 }
  0xa7   :  { %v33_v10 = vsub.f32 %v30_v9, %v32_v8 }
  0xa9   :  { %v34_v11 = vmul.f32 0.003921569, %v33_v10 }
  0xab   :  { %v35_v12 = vmax.f32 %v34_v11, 0.0 }
  0xad   :  { %71 = vrsqrt.f32 %v35_v12  ;;  %vm38_vm0 = vcmp.eq.f32.partialorder %v35_v12, inf  ;;  %v41_v15 = vand.u32 2147483648, %v35_v12  ;;  %vm40_vm1 = vcmp.eq.f32.partialorder %v35_v12, 0.0 }
  0xb7   :  { %v72_v13 = vpop.eup %71 }
  0xb8   :  { %v37_v14 = vmul.f32 %v72_v13, %v35_v12 }
  0xba   :  { %v39_v16 = vsel %vm38_vm0, %v35_v12, %v37_v14 }
  0xbb   :  { %v42_v17 = vsel %vm40_vm1, %v41_v15, %v39_v16 }
  0xbc   :  { %73 = vrcp.f32 %v42_v17 }
  0xc6   :  { %v74_v18 = vpop.eup %73 }
  0xc7   :  { %v45_v19 = vmul.f32 %v74_v18, %v42_v17 }
  0xc9   :  { %v46_v20 = vsub.f32 2.0, %v45_v19 }
  0xcb   :  { %v47_v23 = vmul.f32 %v74_v18, %v46_v20 }
  0xcd   :  { %v50_v24 = vmul.f32 %v48_v21, %v47_v23  ;;  %v51_v25 = vmul.f32 %v49_v22, %v47_v23 }
  0xcf   :  { %52 = vst [vmem:[#allocation5] sm:$0xff] %v50_v24  ;;  %53 = vst [vmem:[#allocation5 + $0x8] sm:$0xff] %v51_v25 }
  0xd0   :  { %108 = shalt.err (!%p105_p12)
}
  0xd1   :  { %s109_s22 = scalar_lea.hbm %s160_s1, 256 }
  0xd2   :  { %p110_p13 = scmp.ne.s32.totalorder %s160_s1, %s109_s22  ;;  %p113_p0 = scmp.lt.u32.totalorder %s109_s22, %s160_s1 }
  0xd4   :  { %p115_p1 = pnand %p113_p0, %p110_p13 }
  0xd6   :  { %118 = shalt.err (!%p115_p1)
}
  0xd7   :  { %63 = dma.vmem_to_hbm [thread:$0]  %s61_s18, 256, %s160_s1, [#allocation4]  }
  0xd8   :  { %121 = dma.done.wait [#allocation4], 256  }
  0xd9   :  { %122 = vsyncadd [#allocation4], 4294967040 }
  0xda   :  { %67 = vsyncpa [#allocation3], 1 }
  0xdb   :  { %68 = vsyncpa [#allocation4], 1 }

</bundles_post_ra>
